<compile_context>
chip_gen: v7x
topology: tpu7x:2x2x1
jax: 0.10.0
libtpu: 0.0.40
codegen_flags: <defaults>
</compile_context>

<pallas_src>
import functools

import jax
import jax.numpy as jnp
from jax.experimental import pallas as pl
from jax.experimental.pallas import tpu as pltpu

LANE = 128      # f32 vreg lane width
SUBLANE = 8     # f32 vreg sublane count

# Set to jnp.bfloat16 on v6e/v7x for fewer MXU passes on the serial recurrence
# (slight numeric drift vs the f32 PyTorch reference); keep float32 for v5e /
# bit-closest parity.
MXU_DTYPE = jnp.float32

_VMEM = pl.BlockSpec(memory_space=pltpu.MemorySpace.VMEM)
_SMEM = pl.BlockSpec(memory_space=pltpu.MemorySpace.SMEM)


def _round_up(n, m):
    return ((n + m - 1) // m) * m


# ---------------------------------------------------------------------------
# Shared in-kernel core:
#   one-hot(ids) @ P_table  ->  p_all [T*Bp, H]   (one tiny MXU matmul,
#                                                  replaces gather + X @ W_ih)
#   h_t = tanh(p_t + h_{t-1} @ W_hh)              unrolled, h lives in vregs
#   logits = h_{T-1} @ W_out + b_out              lane-padded [Bp, Cp]
# ---------------------------------------------------------------------------
def _rnn_logits_core(ids_ref, ptab_ref, whh_ref, wout_ref, bout_ref,
                     *, T, B, Bp, V, mxu_dtype):
    TB = T * Bp
    H = whh_ref.shape[0]

    # Materialize the SMEM token ids as a [T*Bp, V] one-hot matrix.
    # Padded batch rows (b >= B) stay all-zero -> their p rows are 0 -> h
    # stays 0 for them (harmless; sliced off / masked later).
    row = jax.lax.broadcasted_iota(jnp.int32, (TB, V), 0)
    col = jax.lax.broadcasted_iota(jnp.int32, (TB, V), 1)
    ids_mat = jnp.full((TB, V), -1, dtype=jnp.int32)
    for t in range(T):
        for b in range(B):
            ids_mat = jnp.where(row == (t * Bp + b), ids_ref[b, t], ids_mat)
    onehot = (col == ids_mat).astype(mxu_dtype)                      # [TB, V]

    # Hoisted "input projection": gather + X @ W_ih collapse into one matmul
    # against the precomputed P_table.
    p_all = jnp.dot(onehot, ptab_ref[...].astype(mxu_dtype),
                    preferred_element_type=jnp.float32)              # [TB, H]

    w_hh = whh_ref[...].astype(mxu_dtype)
    h = jnp.zeros((Bp, H), jnp.float32)                              # h_0 = 0
    # TODO(synk): on v7x, hold W_hh resident via pltpu.matmul_push_rhs /
    # matmul_acc_lhs (MRB accumulation) to drop the per-step weight reload and
    # fold the VPU add into the MXU accumulate.
    for t in range(T):
        p_t = p_all[t * Bp:(t + 1) * Bp, :]                          # static, sublane-aligned
        h = jnp.tanh(p_t + jnp.dot(h.astype(mxu_dtype), w_hh,
                                   preferred_element_type=jnp.float32))

    # Linear head on the final hidden state (lane-dense [Bp, Cp] result).
    return (jnp.dot(h.astype(mxu_dtype), wout_ref[...].astype(mxu_dtype),
                    preferred_element_type=jnp.float32)
            + bout_ref[...])


def rnn_logits_kernel(ids_ref, ptab_ref, whh_ref, wout_ref, bout_ref, out_ref,
                      *, T, B, Bp, V, mxu_dtype):
    out_ref[...] = _rnn_logits_core(ids_ref, ptab_ref, whh_ref, wout_ref,
                                    bout_ref, T=T, B=B, Bp=Bp, V=V,
                                    mxu_dtype=mxu_dtype)


def rnn_loss_kernel(ids_ref, y_ref, ptab_ref, whh_ref, wout_ref, bout_ref,
                    loss_ref, *, T, B, Bp, V, C, mxu_dtype):
    logits = _rnn_logits_core(ids_ref, ptab_ref, whh_ref, wout_ref, bout_ref,
                              T=T, B=B, Bp=Bp, V=V, mxu_dtype=mxu_dtype)
    Cp = logits.shape[1]

    lane = jax.lax.broadcasted_iota(jnp.int32, (Bp, Cp), 1)
    rowi = jax.lax.broadcasted_iota(jnp.int32, (Bp, Cp), 0)

    # Fused cross-entropy: padded class lanes masked out before the softmax,
    # padded batch rows excluded from the mean.
    masked = jnp.where(lane < C, logits, jnp.float32(-1e30))
    m = jnp.max(masked, axis=-1, keepdims=True)
    ex = jnp.exp(masked - m)
    logp = masked - m - jnp.log(jnp.sum(ex, axis=-1, keepdims=True))

    ymat = jnp.full((Bp, Cp), -1, dtype=jnp.int32)
    for b in range(B):
        ymat = jnp.where(rowi == b, y_ref[b], ymat)
    picked = jnp.where((lane == ymat) & (rowi < B), logp, 0.0)
    loss_ref[0, 0] = -jnp.sum(picked) / B


def _cost(T, B, Bp, V, H, Cp, with_loss=False):
    flops = 2 * (T * Bp * V * H + T * Bp * H * H + Bp * H * Cp)
    trans = T * Bp * H + (2 * Bp * Cp if with_loss else 0)
    bytes_accessed = 4 * (B * T + V * H + H * H + H * Cp + Cp + Bp * Cp)
    return pl.CostEstimate(flops=flops, transcendentals=trans,
                           bytes_accessed=bytes_accessed)


# ---------------------------------------------------------------------------
# Wrappers: zero per-call preprocessing — ids go to SMEM, weights to VMEM.
# ---------------------------------------------------------------------------
def rnn_forward_logits(params, ids):
    B, T = ids.shape
    V, H = params["p_table"].shape
    Cp = params["w_out_p"].shape[1]
    C = params["w_out"].shape[1]
    Bp = _round_up(max(B, SUBLANE), SUBLANE)

    out = pl.pallas_call(
        functools.partial(rnn_logits_kernel, T=T, B=B, Bp=Bp, V=V,
                          mxu_dtype=MXU_DTYPE),
        out_shape=jax.ShapeDtypeStruct((Bp, Cp), jnp.float32),
        in_specs=[_SMEM, _VMEM, _VMEM, _VMEM, _VMEM],
        out_specs=_VMEM,
        cost_estimate=_cost(T, B, Bp, V, H, Cp),
    )(ids, params["p_table"], params["w_hh"], params["w_out_p"],
      params["b_out_p"])
    return out[:B, :C]
    # TODO(synk): for large B/T, add a "parallel" batch grid axis (shards over
    # v7x's 2 TensorCores; no-op on v5e/v6e) and size per-block VMEM to v7x's
    # 32 MiB scoped / 64 MiB physical limit rather than 128 MiB (v5e/v6e).


def rnn_forward_loss(params, ids, y):
    B, T = ids.shape
    V, H = params["p_table"].shape
    Cp = params["w_out_p"].shape[1]
    C = params["w_out"].shape[1]
    Bp = _round_up(max(B, SUBLANE), SUBLANE)

    loss = pl.pallas_call(
        functools.partial(rnn_loss_kernel, T=T, B=B, Bp=Bp, V=V, C=C,
                          mxu_dtype=MXU_DTYPE),
        out_shape=jax.ShapeDtypeStruct((1, 1), jnp.float32),
        in_specs=[_SMEM, _SMEM, _VMEM, _VMEM, _VMEM, _VMEM],
        out_specs=_SMEM,
        cost_estimate=_cost(T, B, Bp, V, H, Cp, with_loss=True),
    )(ids, y, params["p_table"], params["w_hh"], params["w_out_p"],
      params["b_out_p"])
    return loss[0, 0]


# ---------------------------------------------------------------------------
# Model setup (PyTorch-default init) + one-time precomputations.
# ---------------------------------------------------------------------------
def init_params(key, num_embeddings, embedding_dim, text_length, hidden_size):
    kE, k1, k2, k3, k4, k5, k6 = jax.random.split(key, 7)
    bound = 1.0 / jnp.sqrt(hidden_size)

    # nn.Embedding: N(0,1), padding_idx=0 row zeroed.
    emb = jax.random.normal(kE, (num_embeddings, embedding_dim), jnp.float32)
    emb = emb.at[0].set(0.0)

    # nn.RNN weights (stored [in, out]) and biases.
    w_ih = jax.random.uniform(k1, (embedding_dim, hidden_size), jnp.float32, -bound, bound)
    w_hh = jax.random.uniform(k2, (hidden_size, hidden_size), jnp.float32, -bound, bound)
    b_ih = jax.random.uniform(k3, (1, hidden_size), jnp.float32, -bound, bound)
    b_hh = jax.random.uniform(k4, (1, hidden_size), jnp.float32, -bound, bound)

    # nn.Linear(hidden_size, text_length + 1), stored [in, out].
    n_classes = text_length + 1
    w_out = jax.random.uniform(k5, (hidden_size, n_classes), jnp.float32, -bound, bound)
    b_out = jax.random.uniform(k6, (1, n_classes), jnp.float32, -bound, bound)

    # ---- one-time precomputation (perf review) ----
    # Fold embedding + RNN input projection into a single lookup table.
    p_table = emb @ w_ih + (b_ih + b_hh)                         # [vocab, H]
    # Lane-pad the output head once, so the kernel's final store is lane-dense.
    Cp = _round_up(n_classes, LANE)
    w_out_p = jnp.pad(w_out, ((0, 0), (0, Cp - n_classes)))
    b_out_p = jnp.pad(b_out, ((0, 0), (0, Cp - n_classes)))

    return dict(emb=emb, w_ih=w_ih, w_hh=w_hh, b_ih=b_ih, b_hh=b_hh,
                w_out=w_out, b_out=b_out,
                p_table=p_table, w_out_p=w_out_p, b_out_p=b_out_p)


def torch_model_forward(params, x, y=None):
    """x: [B, T] int token ids.  Returns logits [B, C], or scalar CE loss if y given."""
    ids = x.astype(jnp.int32)
    if y is None:
        return rnn_forward_logits(params, ids)
    return rnn_forward_loss(params, ids, y.astype(jnp.int32))


if __name__ == "__main__":
    # Small shapes consistent with the module:
    #   vocab=10, embedding_dim=32, text_length=8 (=> 9 classes), hidden=32, batch=2.
    NUM_EMB, EMB_DIM, TEXT_LEN, HIDDEN, BATCH = 10, 32, 8, 32, 2

    key = jax.random.PRNGKey(0)
    kp, kx, ky = jax.random.split(key, 3)
    params = init_params(kp, NUM_EMB, EMB_DIM, TEXT_LEN, HIDDEN)

    x = jax.random.randint(kx, (BATCH, TEXT_LEN), 0, NUM_EMB, dtype=jnp.int32)
    y = jax.random.randint(ky, (BATCH,), 0, TEXT_LEN + 1, dtype=jnp.int32)

    fwd = jax.jit(torch_model_forward)
    logits = fwd(params, x)        # inference path -> [B, TEXT_LEN + 1]
    loss = fwd(params, x, y)       # training path  -> scalar CE loss
    jax.block_until_ready((logits, loss))

    assert logits.shape == (BATCH, TEXT_LEN + 1)
    assert loss.shape == ()
    assert bool(jnp.all(jnp.isfinite(logits))) and bool(jnp.isfinite(loss))
    print("KERNEL_OK")
</pallas_src>

<mosaic_0001>
module attributes {stable_mosaic.version = 11 : i64} {
  func.func @rnn_logits_kernel(%arg0: memref<2x8xi32, #tpu.memory_space<smem>>, %arg1: memref<10x32xf32, #tpu.memory_space<vmem>>, %arg2: memref<32x32xf32, #tpu.memory_space<vmem>>, %arg3: memref<32x128xf32, #tpu.memory_space<vmem>>, %arg4: memref<1x128xf32, #tpu.memory_space<vmem>>, %arg5: memref<8x128xf32, #tpu.memory_space<vmem>>) attributes {dimension_semantics = [], scalar_prefetch = 0 : i64, scratch_operands = 0 : i64, tpu.core_type = #tpu.core_type<tc>} {
    %0 = tpu.iota {dimensions = array<i32: 0>} : vector<64x10xi32>
    %1 = tpu.iota {dimensions = array<i32: 1>} : vector<64x10xi32>
    %c-1_i32 = arith.constant -1 : i32
    %2 = vector.broadcast %c-1_i32 : i32 to vector<64x10xi32>
    %c0_i32 = arith.constant 0 : i32
    %3 = vector.broadcast %c0_i32 : i32 to vector<64x10xi32>
    %4 = arith.cmpi eq, %0, %3 : vector<64x10xi32>
    %c0 = arith.constant 0 : index
    %c0_0 = arith.constant 0 : index
    %5 = memref.load %arg0[%c0, %c0_0] : memref<2x8xi32, #tpu.memory_space<smem>>
    %6 = vector.broadcast %5 : i32 to vector<64x10xi32>
    %7 = arith.select %4, %6, %2 : vector<64x10xi1>, vector<64x10xi32>
    %c1_i32 = arith.constant 1 : i32
    %8 = vector.broadcast %c1_i32 : i32 to vector<64x10xi32>
    %9 = arith.cmpi eq, %0, %8 : vector<64x10xi32>
    %c1 = arith.constant 1 : index
    %c0_1 = arith.constant 0 : index
    %10 = memref.load %arg0[%c1, %c0_1] : memref<2x8xi32, #tpu.memory_space<smem>>
    %11 = vector.broadcast %10 : i32 to vector<64x10xi32>
    %12 = arith.select %9, %11, %7 : vector<64x10xi1>, vector<64x10xi32>
    %c8_i32 = arith.constant 8 : i32
    %13 = vector.broadcast %c8_i32 : i32 to vector<64x10xi32>
    %14 = arith.cmpi eq, %0, %13 : vector<64x10xi32>
    %c0_2 = arith.constant 0 : index
    %c1_3 = arith.constant 1 : index
    %15 = memref.load %arg0[%c0_2, %c1_3] : memref<2x8xi32, #tpu.memory_space<smem>>
    %16 = vector.broadcast %15 : i32 to vector<64x10xi32>
    %17 = arith.select %14, %16, %12 : vector<64x10xi1>, vector<64x10xi32>
    %c9_i32 = arith.constant 9 : i32
    %18 = vector.broadcast %c9_i32 : i32 to vector<64x10xi32>
    %19 = arith.cmpi eq, %0, %18 : vector<64x10xi32>
    %c1_4 = arith.constant 1 : index
    %c1_5 = arith.constant 1 : index
    %20 = memref.load %arg0[%c1_4, %c1_5] : memref<2x8xi32, #tpu.memory_space<smem>>
    %21 = vector.broadcast %20 : i32 to vector<64x10xi32>
    %22 = arith.select %19, %21, %17 : vector<64x10xi1>, vector<64x10xi32>
    %c16_i32 = arith.constant 16 : i32
    %23 = vector.broadcast %c16_i32 : i32 to vector<64x10xi32>
    %24 = arith.cmpi eq, %0, %23 : vector<64x10xi32>
    %c0_6 = arith.constant 0 : index
    %c2 = arith.constant 2 : index
    %25 = memref.load %arg0[%c0_6, %c2] : memref<2x8xi32, #tpu.memory_space<smem>>
    %26 = vector.broadcast %25 : i32 to vector<64x10xi32>
    %27 = arith.select %24, %26, %22 : vector<64x10xi1>, vector<64x10xi32>
    %c17_i32 = arith.constant 17 : i32
    %28 = vector.broadcast %c17_i32 : i32 to vector<64x10xi32>
    %29 = arith.cmpi eq, %0, %28 : vector<64x10xi32>
    %c1_7 = arith.constant 1 : index
    %c2_8 = arith.constant 2 : index
    %30 = memref.load %arg0[%c1_7, %c2_8] : memref<2x8xi32, #tpu.memory_space<smem>>
    %31 = vector.broadcast %30 : i32 to vector<64x10xi32>
    %32 = arith.select %29, %31, %27 : vector<64x10xi1>, vector<64x10xi32>
    %c24_i32 = arith.constant 24 : i32
    %33 = vector.broadcast %c24_i32 : i32 to vector<64x10xi32>
    %34 = arith.cmpi eq, %0, %33 : vector<64x10xi32>
    %c0_9 = arith.constant 0 : index
    %c3 = arith.constant 3 : index
    %35 = memref.load %arg0[%c0_9, %c3] : memref<2x8xi32, #tpu.memory_space<smem>>
    %36 = vector.broadcast %35 : i32 to vector<64x10xi32>
    %37 = arith.select %34, %36, %32 : vector<64x10xi1>, vector<64x10xi32>
    %c25_i32 = arith.constant 25 : i32
    %38 = vector.broadcast %c25_i32 : i32 to vector<64x10xi32>
    %39 = arith.cmpi eq, %0, %38 : vector<64x10xi32>
    %c1_10 = arith.constant 1 : index
    %c3_11 = arith.constant 3 : index
    %40 = memref.load %arg0[%c1_10, %c3_11] : memref<2x8xi32, #tpu.memory_space<smem>>
    %41 = vector.broadcast %40 : i32 to vector<64x10xi32>
    %42 = arith.select %39, %41, %37 : vector<64x10xi1>, vector<64x10xi32>
    %c32_i32 = arith.constant 32 : i32
    %43 = vector.broadcast %c32_i32 : i32 to vector<64x10xi32>
    %44 = arith.cmpi eq, %0, %43 : vector<64x10xi32>
    %c0_12 = arith.constant 0 : index
    %c4 = arith.constant 4 : index
    %45 = memref.load %arg0[%c0_12, %c4] : memref<2x8xi32, #tpu.memory_space<smem>>
    %46 = vector.broadcast %45 : i32 to vector<64x10xi32>
    %47 = arith.select %44, %46, %42 : vector<64x10xi1>, vector<64x10xi32>
    %c33_i32 = arith.constant 33 : i32
    %48 = vector.broadcast %c33_i32 : i32 to vector<64x10xi32>
    %49 = arith.cmpi eq, %0, %48 : vector<64x10xi32>
    %c1_13 = arith.constant 1 : index
    %c4_14 = arith.constant 4 : index
    %50 = memref.load %arg0[%c1_13, %c4_14] : memref<2x8xi32, #tpu.memory_space<smem>>
    %51 = vector.broadcast %50 : i32 to vector<64x10xi32>
    %52 = arith.select %49, %51, %47 : vector<64x10xi1>, vector<64x10xi32>
    %c40_i32 = arith.constant 40 : i32
    %53 = vector.broadcast %c40_i32 : i32 to vector<64x10xi32>
    %54 = arith.cmpi eq, %0, %53 : vector<64x10xi32>
    %c0_15 = arith.constant 0 : index
    %c5 = arith.constant 5 : index
    %55 = memref.load %arg0[%c0_15, %c5] : memref<2x8xi32, #tpu.memory_space<smem>>
    %56 = vector.broadcast %55 : i32 to vector<64x10xi32>
    %57 = arith.select %54, %56, %52 : vector<64x10xi1>, vector<64x10xi32>
    %c41_i32 = arith.constant 41 : i32
    %58 = vector.broadcast %c41_i32 : i32 to vector<64x10xi32>
    %59 = arith.cmpi eq, %0, %58 : vector<64x10xi32>
    %c1_16 = arith.constant 1 : index
    %c5_17 = arith.constant 5 : index
    %60 = memref.load %arg0[%c1_16, %c5_17] : memref<2x8xi32, #tpu.memory_space<smem>>
    %61 = vector.broadcast %60 : i32 to vector<64x10xi32>
    %62 = arith.select %59, %61, %57 : vector<64x10xi1>, vector<64x10xi32>
    %c48_i32 = arith.constant 48 : i32
    %63 = vector.broadcast %c48_i32 : i32 to vector<64x10xi32>
    %64 = arith.cmpi eq, %0, %63 : vector<64x10xi32>
    %c0_18 = arith.constant 0 : index
    %c6 = arith.constant 6 : index
    %65 = memref.load %arg0[%c0_18, %c6] : memref<2x8xi32, #tpu.memory_space<smem>>
    %66 = vector.broadcast %65 : i32 to vector<64x10xi32>
    %67 = arith.select %64, %66, %62 : vector<64x10xi1>, vector<64x10xi32>
    %c49_i32 = arith.constant 49 : i32
    %68 = vector.broadcast %c49_i32 : i32 to vector<64x10xi32>
    %69 = arith.cmpi eq, %0, %68 : vector<64x10xi32>
    %c1_19 = arith.constant 1 : index
    %c6_20 = arith.constant 6 : index
    %70 = memref.load %arg0[%c1_19, %c6_20] : memref<2x8xi32, #tpu.memory_space<smem>>
    %71 = vector.broadcast %70 : i32 to vector<64x10xi32>
    %72 = arith.select %69, %71, %67 : vector<64x10xi1>, vector<64x10xi32>
    %c56_i32 = arith.constant 56 : i32
    %73 = vector.broadcast %c56_i32 : i32 to vector<64x10xi32>
    %74 = arith.cmpi eq, %0, %73 : vector<64x10xi32>
    %c0_21 = arith.constant 0 : index
    %c7 = arith.constant 7 : index
    %75 = memref.load %arg0[%c0_21, %c7] : memref<2x8xi32, #tpu.memory_space<smem>>
    %76 = vector.broadcast %75 : i32 to vector<64x10xi32>
    %77 = arith.select %74, %76, %72 : vector<64x10xi1>, vector<64x10xi32>
    %c57_i32 = arith.constant 57 : i32
    %78 = vector.broadcast %c57_i32 : i32 to vector<64x10xi32>
    %79 = arith.cmpi eq, %0, %78 : vector<64x10xi32>
    %c1_22 = arith.constant 1 : index
    %c7_23 = arith.constant 7 : index
    %80 = memref.load %arg0[%c1_22, %c7_23] : memref<2x8xi32, #tpu.memory_space<smem>>
    %81 = vector.broadcast %80 : i32 to vector<64x10xi32>
    %82 = arith.select %79, %81, %77 : vector<64x10xi1>, vector<64x10xi32>
    %83 = arith.cmpi eq, %1, %82 : vector<64x10xi32>
    %84 = arith.extui %83 : vector<64x10xi1> to vector<64x10xi32>
    %85 = arith.sitofp %84 : vector<64x10xi32> to vector<64x10xf32>
    %c0_24 = arith.constant 0 : index
    %c0_25 = arith.constant 0 : index
    %86 = vector.load %arg1[%c0_24, %c0_25] : memref<10x32xf32, #tpu.memory_space<vmem>>, vector<10x32xf32>
    %cst = arith.constant dense<0.000000e+00> : vector<64x32xf32>
    %87 = tpu.matmul %85, %86, %cst {dimension_numbers = #tpu.dot_dimension_numbers<[1], [0], [0], [1], [0, 0, 1, 1], [], []>} : vector<64x10xf32>, vector<10x32xf32>, vector<64x32xf32> -> vector<64x32xf32>
    %c0_26 = arith.constant 0 : index
    %c0_27 = arith.constant 0 : index
    %88 = vector.load %arg2[%c0_26, %c0_27] : memref<32x32xf32, #tpu.memory_space<vmem>>, vector<32x32xf32>
    %cst_28 = arith.constant 0.000000e+00 : f32
    %89 = vector.broadcast %cst_28 : f32 to vector<8x32xf32>
    %90 = vector.extract_strided_slice %87 {offsets = [0, 0], sizes = [8, 32], strides = [1, 1]} : vector<64x32xf32> to vector<8x32xf32>
    %cst_29 = arith.constant dense<0.000000e+00> : vector<8x32xf32>
    %91 = tpu.matmul %89, %88, %cst_29 {dimension_numbers = #tpu.dot_dimension_numbers<[1], [0], [0], [1], [0, 0, 1, 1], [], []>} : vector<8x32xf32>, vector<32x32xf32>, vector<8x32xf32> -> vector<8x32xf32>
    %92 = arith.addf %90, %91 : vector<8x32xf32>
    %93 = math.tanh %92 : vector<8x32xf32>
    %94 = vector.extract_strided_slice %87 {offsets = [8, 0], sizes = [8, 32], strides = [1, 1]} : vector<64x32xf32> to vector<8x32xf32>
    %cst_30 = arith.constant dense<0.000000e+00> : vector<8x32xf32>
    %95 = tpu.matmul %93, %88, %cst_30 {dimension_numbers = #tpu.dot_dimension_numbers<[1], [0], [0], [1], [0, 0, 1, 1], [], []>} : vector<8x32xf32>, vector<32x32xf32>, vector<8x32xf32> -> vector<8x32xf32>
    %96 = arith.addf %94, %95 : vector<8x32xf32>
    %97 = math.tanh %96 : vector<8x32xf32>
    %98 = vector.extract_strided_slice %87 {offsets = [16, 0], sizes = [8, 32], strides = [1, 1]} : vector<64x32xf32> to vector<8x32xf32>
    %cst_31 = arith.constant dense<0.000000e+00> : vector<8x32xf32>
    %99 = tpu.matmul %97, %88, %cst_31 {dimension_numbers = #tpu.dot_dimension_numbers<[1], [0], [0], [1], [0, 0, 1, 1], [], []>} : vector<8x32xf32>, vector<32x32xf32>, vector<8x32xf32> -> vector<8x32xf32>
    %100 = arith.addf %98, %99 : vector<8x32xf32>
    %101 = math.tanh %100 : vector<8x32xf32>
    %102 = vector.extract_strided_slice %87 {offsets = [24, 0], sizes = [8, 32], strides = [1, 1]} : vector<64x32xf32> to vector<8x32xf32>
    %cst_32 = arith.constant dense<0.000000e+00> : vector<8x32xf32>
    %103 = tpu.matmul %101, %88, %cst_32 {dimension_numbers = #tpu.dot_dimension_numbers<[1], [0], [0], [1], [0, 0, 1, 1], [], []>} : vector<8x32xf32>, vector<32x32xf32>, vector<8x32xf32> -> vector<8x32xf32>
    %104 = arith.addf %102, %103 : vector<8x32xf32>
    %105 = math.tanh %104 : vector<8x32xf32>
    %106 = vector.extract_strided_slice %87 {offsets = [32, 0], sizes = [8, 32], strides = [1, 1]} : vector<64x32xf32> to vector<8x32xf32>
    %cst_33 = arith.constant dense<0.000000e+00> : vector<8x32xf32>
    %107 = tpu.matmul %105, %88, %cst_33 {dimension_numbers = #tpu.dot_dimension_numbers<[1], [0], [0], [1], [0, 0, 1, 1], [], []>} : vector<8x32xf32>, vector<32x32xf32>, vector<8x32xf32> -> vector<8x32xf32>
    %108 = arith.addf %106, %107 : vector<8x32xf32>
    %109 = math.tanh %108 : vector<8x32xf32>
    %110 = vector.extract_strided_slice %87 {offsets = [40, 0], sizes = [8, 32], strides = [1, 1]} : vector<64x32xf32> to vector<8x32xf32>
    %cst_34 = arith.constant dense<0.000000e+00> : vector<8x32xf32>
    %111 = tpu.matmul %109, %88, %cst_34 {dimension_numbers = #tpu.dot_dimension_numbers<[1], [0], [0], [1], [0, 0, 1, 1], [], []>} : vector<8x32xf32>, vector<32x32xf32>, vector<8x32xf32> -> vector<8x32xf32>
    %112 = arith.addf %110, %111 : vector<8x32xf32>
    %113 = math.tanh %112 : vector<8x32xf32>
    %114 = vector.extract_strided_slice %87 {offsets = [48, 0], sizes = [8, 32], strides = [1, 1]} : vector<64x32xf32> to vector<8x32xf32>
    %cst_35 = arith.constant dense<0.000000e+00> : vector<8x32xf32>
    %115 = tpu.matmul %113, %88, %cst_35 {dimension_numbers = #tpu.dot_dimension_numbers<[1], [0], [0], [1], [0, 0, 1, 1], [], []>} : vector<8x32xf32>, vector<32x32xf32>, vector<8x32xf32> -> vector<8x32xf32>
    %116 = arith.addf %114, %115 : vector<8x32xf32>
    %117 = math.tanh %116 : vector<8x32xf32>
    %118 = vector.extract_strided_slice %87 {offsets = [56, 0], sizes = [8, 32], strides = [1, 1]} : vector<64x32xf32> to vector<8x32xf32>
    %cst_36 = arith.constant dense<0.000000e+00> : vector<8x32xf32>
    %119 = tpu.matmul %117, %88, %cst_36 {dimension_numbers = #tpu.dot_dimension_numbers<[1], [0], [0], [1], [0, 0, 1, 1], [], []>} : vector<8x32xf32>, vector<32x32xf32>, vector<8x32xf32> -> vector<8x32xf32>
    %120 = arith.addf %118, %119 : vector<8x32xf32>
    %121 = math.tanh %120 : vector<8x32xf32>
    %c0_37 = arith.constant 0 : index
    %c0_38 = arith.constant 0 : index
    %122 = vector.load %arg3[%c0_37, %c0_38] : memref<32x128xf32, #tpu.memory_space<vmem>>, vector<32x128xf32>
    %cst_39 = arith.constant dense<0.000000e+00> : vector<8x128xf32>
    %123 = tpu.matmul %121, %122, %cst_39 {dimension_numbers = #tpu.dot_dimension_numbers<[1], [0], [0], [1], [0, 0, 1, 1], [], []>} : vector<8x32xf32>, vector<32x128xf32>, vector<8x128xf32> -> vector<8x128xf32>
    %c0_40 = arith.constant 0 : index
    %c0_41 = arith.constant 0 : index
    %124 = vector.load %arg4[%c0_40, %c0_41] : memref<1x128xf32, #tpu.memory_space<vmem>>, vector<1x128xf32>
    %125 = vector.broadcast %124 : vector<1x128xf32> to vector<8x128xf32>
    %126 = arith.addf %123, %125 : vector<8x128xf32>
    %c0_42 = arith.constant 0 : index
    %c0_43 = arith.constant 0 : index
    %127 = vector.load %arg5[%c0_42, %c0_43] : memref<8x128xf32, #tpu.memory_space<vmem>>, vector<8x128xf32>
    tpu.vector_store %arg5[%c0_42, %c0_43], %126 {strides = array<i32>} : memref<8x128xf32, #tpu.memory_space<vmem>>, vector<8x128xf32>,
    return
  }
}

</mosaic_0001>

<bundles_post_ra>
// kernel: torch_model_forward.1
= control target key start
LH: loop header
LB: loop body
LE: loop exit
PB: predicated region body
PF: predicated region fallthrough
CT: control target
= control target key end

     0   :  { %10 = vsyncpa [#allocation4], 0  ;;  %s1877_s0 = inlined_call_operand.vmem [shape: s32[2,8], index: 0, kind: input, shape index: {}]   ;;  %s1878_s1 = inlined_call_operand.hbm [shape: f32[10,32], index: 1, kind: input, shape index: {}]   ;;  %s1879_s2 = inlined_call_operand.hbm [shape: f32[32,32], index: 2, kind: input, shape index: {}]   ;;  %s1880_s3 = inlined_call_operand.hbm [shape: f32[32,128], index: 3, kind: input, shape index: {}]   ;;  %s1881_s4 = inlined_call_operand.hbm [shape: f32[1,128], index: 4, kind: input, shape index: {}]   ;;  %s1882_s5 = inlined_call_operand.vmem [shape: f32[8,128], index: 5, kind: output, shape index: {}]  }
   0x1   :  { %11 = vsyncpa [#allocation3], 0 }
   0x2   :  { %12 = vsyncpa [#allocation7], 0 }
   0x3   :  { %13 = vsyncpa [#allocation10], 0  ;;  %s20_s20 = sshll.u32 %s1877_s0, 4  ;;  %s1649_s21 = smov [#allocation6]   ;;  %s21_s20 = int_to_ptr.vmem [resolvable:$true] %s20_s20 }
   0x4   :  { %s41_s22 = sshll.u32 %s1649_s21, 4  ;;  %s1541_s25 = scalar_lea.hbm %s1879_s2, 512  ;;  %s42_s22 = int_to_ptr.vmem [resolvable:$true] %s41_s22 }
   0x5   :  { %p1542_p0 = scmp.ne.s32.totalorder %s1879_s2, %s1541_s25  ;;  %p1545_p1 = scmp.lt.u32.totalorder %s1541_s25, %s1879_s2 }
   0x7   :  { %p1547_p2 = pnand %p1545_p1, %p1542_p0 }
   0x9   :  { %1550 = shalt.err (!%p1547_p2)
}
   0xa   :  { %s1551_s30 = scalar_lea.vmem %s42_s22, 512  ;;  %p1556_p4 = scmp.lt.s32.totalorder %s42_s22, %s42_s22 }
   0xb   :  { %p1552_p3 = scmp.ne.s32.totalorder %s42_s22, %s1551_s30  ;;  %p1557_p5 = scmp.lt.s32.totalorder %s1551_s30, %s1551_s30 }
   0xd   :  { %p1558_p6 = por %p1557_p5, %p1556_p4 }
   0xf   :  { %p1559_p7 = pnand %p1558_p6, %p1552_p3 }
  0x11   :  { %1562 = shalt.err (!%p1559_p7)
}
  0x12   :  { %s1650_s0 = smov 128   ;;  %s1651_s6 = smov 8  }
  0x13   :  { %47 = dma.hbm_to_vmem [thread:$0]  %s1879_s2, 512, %s42_s22, [#allocation7], %s1650_s0, %s1650_s0, %s1651_s6  }
  0x14   :  { %s1563_s9 = scalar_lea.vmem %s21_s20, 32  ;;  %p1568_p9 = scmp.lt.s32.totalorder %s21_s20, %s21_s20 }
  0x15   :  { %p1564_p8 = scmp.ne.s32.totalorder %s21_s20, %s1563_s9  ;;  %p1569_p10 = scmp.lt.s32.totalorder %s1563_s9, %s1563_s9 }
  0x17   :  { %p1570_p11 = por %p1569_p10, %p1568_p9 }
  0x19   :  { %p1571_p12 = pnand %p1570_p11, %p1564_p8 }
  0x1b   :  { %1574 = shalt.err (!%p1571_p12)
}
  0x1c   :  { %s1652_s10 = smov [#allocation2]   ;;  %s1653_s11 = smov [#allocation5]  }
  0x1d   :  { %23 = dma.vmem_to_smem %s21_s20, 32, %s1652_s10, [#allocation4]  }
  0x1e   :  { %s29_s12 = sshll.u32 %s1653_s11, 4  ;;  %s1654_s13 = smov [#allocation8]   ;;  %s30_s12 = int_to_ptr.vmem [resolvable:$true] %s29_s12 }
  0x1f   :  { %s53_s14 = sshll.u32 %s1654_s13, 4  ;;  %s1575_s2 = scalar_lea.hbm %s1878_s1, 256  ;;  %s1708_s14 = int_to_ptr.vmem [resolvable:$true] %s53_s14 }
  0x20   :  { %p1576_p13 = scmp.ne.s32.totalorder %s1878_s1, %s1575_s2  ;;  %p1579_p0 = scmp.lt.u32.totalorder %s1575_s2, %s1878_s1 }
  0x22   :  { %p1581_p1 = pnand %p1579_p0, %p1576_p13 }
  0x24   :  { %1584 = shalt.err (!%p1581_p1)
}
  0x25   :  { %s1585_s20 = scalar_lea.vmem %s30_s12, 256  ;;  %p1590_p3 = scmp.lt.s32.totalorder %s30_s12, %s30_s12 }
  0x26   :  { %p1586_p2 = scmp.ne.s32.totalorder %s30_s12, %s1585_s20  ;;  %p1591_p4 = scmp.lt.s32.totalorder %s1585_s20, %s1585_s20 }
  0x28   :  { %p1592_p5 = por %p1591_p4, %p1590_p3 }
  0x2a   :  { %p1593_p6 = pnand %p1592_p5, %p1586_p2 }
  0x2c   :  { %1596 = shalt.err (!%p1593_p6)
}
  0x2d   :  { %35 = dma.hbm_to_vmem [thread:$0]  %s1878_s1, 256, %s30_s12, [#allocation3], %s1650_s0, %s1650_s0, %s1651_s6  }
  0x2e   :  { %s1597_s26 = scalar_lea.hbm %s1880_s3, 512 }
  0x2f   :  { %p1598_p7 = scmp.ne.s32.totalorder %s1880_s3, %s1597_s26  ;;  %p1601_p8 = scmp.lt.u32.totalorder %s1597_s26, %s1880_s3 }
  0x31   :  { %p1603_p9 = pnand %p1601_p8, %p1598_p7 }
  0x33   :  { %1606 = shalt.err (!%p1603_p9)
}
  0x34   :  { %s1607_s7 = scalar_lea.vmem %s1708_s14, 512  ;;  %p1612_p11 = scmp.lt.s32.totalorder %s1708_s14, %s1708_s14 }
  0x35   :  { %p1608_p10 = scmp.ne.s32.totalorder %s1708_s14, %s1607_s7  ;;  %p1613_p12 = scmp.lt.s32.totalorder %s1607_s7, %s1607_s7 }
  0x37   :  { %p1614_p13 = por %p1613_p12, %p1612_p11 }
  0x39   :  { %p1615_p0 = pnand %p1614_p13, %p1608_p10 }
  0x3b   :  { %1618 = shalt.err (!%p1615_p0)
}
  0x3c   :  { %59 = dma.hbm_to_vmem [thread:$0]  %s1880_s3, 512, %s1708_s14, [#allocation7], %s1650_s0, %s1650_s0, %s1651_s6  }
  0x3d   :  { %s1655_s9 = smov [#allocation9]   ;;  %s1619_s13 = scalar_lea.hbm %s1881_s4, 16 }
  0x3e   :  { %s66_s10 = sshll.u32 %s1655_s9, 4  ;;  %p1620_p1 = scmp.ne.s32.totalorder %s1881_s4, %s1619_s13  ;;  %s67_s10 = int_to_ptr.vmem [resolvable:$true] %s66_s10 }
  0x3f   :  { %p1623_p2 = scmp.lt.u32.totalorder %s1619_s13, %s1881_s4 }
  0x41   :  { %p1625_p3 = pnand %p1623_p2, %p1620_p1 }
  0x43   :  { %1628 = shalt.err (!%p1625_p3)
}
  0x44   :  { %s1629_s18 = scalar_lea.vmem %s67_s10, 16  ;;  %s1633_s3 = scalar_lea.vmem %s67_s10, 32 }
  0x45   :  { %p1630_p4 = scmp.ne.s32.totalorder %s67_s10, %s1629_s18  ;;  %p1634_p5 = scmp.lt.s32.totalorder %s67_s10, %s67_s10 }
  0x46   :  { %p1635_p6 = scmp.lt.s32.totalorder %s1633_s3, %s1629_s18 }
  0x48   :  { %p1636_p7 = por %p1635_p6, %p1634_p5 }
  0x4a   :  { %p1637_p8 = pnand %p1636_p7, %p1630_p4 }
  0x4c   :  { %1640 = shalt.err (!%p1637_p8)
}
  0x4d   :  { %69 = dma.hbm_to_vmem [thread:$0]  %s1881_s4, 16, %s67_s10, [#allocation10]  }
  0x4e   :  { %1641 = dma.done.wait [#allocation4], 32  }
  0x4f   :  { %1642 = vsyncadd [#allocation4], 4294967264 }
  0x50   :  { %1643 = dma.done.wait [#allocation3], 256  }
  0x51   :  { %1644 = vsyncadd [#allocation3], 4294967040 }
  0x52   :  { %1645 = dma.done.wait [#allocation7], 1024  }
  0x53   :  { %1646 = vsyncadd [#allocation7], 4294966272 }
  0x54   :  { %1647 = dma.done.wait [#allocation10], 16  }
  0x55   :  { %1648 = vsyncadd [#allocation10], 4294967280 }
  0x56   :  { %85 = sfence }
  0x57   :  { %v545_v0 = vld [vmem:[#allocation6] sm:$0xff]  ;;  %v546_v1 = vld [vmem:[#allocation6 + $0x8] sm:$0xff]  ;;  %v409_v2 = vld [vmem:[#allocation5] sm:$0xff]  ;;  %vm436_vm0 = vcmask 1041408   ;;  %v86_v3 = vlaneseq  ;;  %v1656_v4 = vmov 0.0|0.0   ;;  %vm1657_vm1 = vmmov 1  }
  0x58   :  { %1460 = vmatprep.subr.bf16.mxu1 %v1656_v4  ;;  %v1758_v5 = vpack.c.bf16 %v546_v1, %v545_v0  ;;  %v410_v6 = vld [vmem:[#allocation5 + $0x8] sm:$0x3]  ;;  %vm1455_vm2 = vmpackc.low %vm436_vm0, %vm1657_vm1  ;;  %v547_v7 = vld [vmem:[#allocation6 + $0x10] sm:$0xff]  ;;  %s105_s4 = sld [smem:[#allocation2]]  ;;  %s1244_s19 = sld [smem:[#allocation2 + $0x1]]  ;;  %vm1658_vm4 = vmmov 0  }
  0x59   :  { %v1454_v8 = vpack.c.bf16 %v410_v6, %v409_v2  ;;  %v548_v9 = vld [vmem:[#allocation6 + $0x18] sm:$0xff]  ;;  %v1760_v10 = vshrl.u32 %v86_v3, 7  ;;  %s1243_s14 = sld [smem:[#allocation2 + $0x80]]  ;;  %s1245_s21 = sld [smem:[#allocation2 + $0x81]]  ;;  %v1659_v13 = vmov 0.0   ;;  %v1770_v14 = vand.u32 127, %v86_v3 }
  0x5a   :  { %1462 = vmatpush3.bf16.msra.mxu1 %v1758_v5  ;;  %v1763_v11 = vpack.c.bf16 %v548_v9, %v547_v7  ;;  %1363 = vmatprep.mubr.msk.f32.mxu1 %vm1658_vm4, %v1659_v13  ;;  %vm411_vm8 = vcmask 80896   ;;  %s1246_s20 = sld [smem:[#allocation2 + $0x2]]  ;;  %vm549_vm14 = vcmask 261120   ;;  %s1248_s23 = sld [smem:[#allocation2 + $0x3]] }
  0x5b   :  { %1456 = vmatprep.subr.msk.bf16.mxu0 %vm1455_vm2, %v1454_v8  ;;  %1463 = vmatprep.subr.bf16.mxu1 %v1656_v4  ;;  %v88_v12 = vadd.s32 8, %v1760_v10  ;;  %vm97_vm3 = vcmp.eq.s32.totalorder %v1760_v10, 0  ;;  %vm115_vm5 = vcmp.eq.s32.totalorder %v1760_v10, 1  ;;  %v89_v25 = vadd.s32 16, %v1760_v10  ;;  %s1247_s22 = sld [smem:[#allocation2 + $0x82]]  ;;  %s1249_s24 = sld [smem:[#allocation2 + $0x83]] }
  0x5c   :  { %1459 = vmatpush3.bf16.msk.msra.mxu0 %vm1455_vm2, %v1454_v8  ;;  %s1250_s25 = sld [smem:[#allocation2 + $0x4]]  ;;  %v90_v37 = vadd.s32 24, %v1760_v10  ;;  %s1252_s27 = sld [smem:[#allocation2 + $0x5]]  ;;  %v91_v41 = vadd.s32 32, %v1760_v10  ;;  %v92_v43 = vadd.s32 40, %v1760_v10  ;;  %v93_v52 = vadd.s32 48, %v1760_v10 }
  0x5d   :  { %1472 = vmatprep.subr.bf16.mxu0 %v1656_v4  ;;  %vm134_vm6 = vcmp.eq.s32.totalorder %v88_v12, 8  ;;  %vm152_vm7 = vcmp.eq.s32.totalorder %v88_v12, 9  ;;  %vm171_vm11 = vcmp.eq.s32.totalorder %v89_v25, 16  ;;  %vm189_vm12 = vcmp.eq.s32.totalorder %v89_v25, 17  ;;  %s1251_s26 = sld [smem:[#allocation2 + $0x84]]  ;;  %s1253_s28 = sld [smem:[#allocation2 + $0x85]] }
  0x5e   :  { %1465 = vmatpush3.bf16.msra.mxu1 %v1763_v11  ;;  %v106_v15 = vstv %s105_s4  ;;  %v142_v19 = vstv %s1244_s19  ;;  %vm208_vm15 = vcmp.eq.s32.totalorder %v90_v37, 24  ;;  %vm226_vm0 = vcmp.eq.s32.totalorder %v90_v37, 25  ;;  %s1808_s29 = sld [smem:[#allocation2 + $0x6]]  ;;  %s1813_s7 = sld [smem:[#allocation2 + $0x7]]  ;;  %v1151_v37 = vld [vmem:[#allocation8 + $0x8] sm:$0xff] }
  0x5f   :  { %v107_v16 = vsel %vm97_vm3, %v106_v15, 4294967295  ;;  %v124_v17 = vstv %s1243_s14  ;;  %1466 = vmatprep.subr.bf16.mxu1 %v1656_v4  ;;  %v160_v20 = vstv %s1245_s21  ;;  %v144_v21 = vsel %vm134_vm6, %v142_v19, 4294967295  ;;  %s1811_s30 = sld [smem:[#allocation2 + $0x86]]  ;;  %s1816_s1 = sld [smem:[#allocation2 + $0x87]] }
  0x60   :  { %v125_v18 = vsel %vm115_vm5, %v124_v17, %v107_v16  ;;  %v162_v23 = vsel %vm152_vm7, %v160_v20, %v144_v21  ;;  %v178_v26 = vstv %s1246_s20  ;;  %v214_v38 = vstv %s1248_s23 }
  0x61   :  { %vm385_vm9 = vcmp.eq.s32.totalorder %v1770_v14, %v125_v18  ;;  %1364 = vmatmul.mubr.f32.vlgmr.msra.gmra.mrb[0].mxu1 %v1659_v13  ;;  %vm386_vm10 = vcmp.eq.s32.totalorder %v1770_v14, %v162_v23  ;;  %v196_v27 = vstv %s1247_s22  ;;  %v181_v28 = vsel %vm171_vm11, %v178_v26, 4294967295 }
  0x62   :  { %v1258_v22 = vsel %vm385_vm9, 1.0, %v1659_v13  ;;  %1468 = vmatpush3.bf16.msra.mxu1 %v1758_v5  ;;  %1374 = vmatprep.mubr.msk.f32.mxu1 %vm1658_vm4, %v1659_v13  ;;  %v1259_v24 = vsel %vm386_vm10, 1.0, %v1659_v13  ;;  %v199_v29 = vsel %vm189_vm12, %v196_v27, %v181_v28  ;;  %v218_v39 = vsel %vm208_vm15, %v214_v38, 4294967295 }
  0x63   :  { %1343 = vmatprep.mubr.msk.f32.mxu0 %vm411_vm8, %v1258_v22  ;;  %1469 = vmatprep.subr.bf16.mxu1 %v1656_v4  ;;  %vm387_vm13 = vcmp.eq.s32.totalorder %v1770_v14, %v199_v29  ;;  %v232_v40 = vstv %s1249_s24  ;;  %vm245_vm2 = vcmp.eq.s32.totalorder %v91_v41, 32  ;;  %v250_v44 = vstv %s1250_s25 }
  0x64   :  { %1344 = vmatmul.mubr.msk.f32.vlgmr.msra.gmra.mrb[0].mxu0 %vm411_vm8, %v1259_v24  ;;  %v1260_v30 = vsel %vm387_vm13, 1.0, %v1659_v13  ;;  %v236_v42 = vsel %vm226_vm0, %v232_v40, %v218_v39  ;;  %v255_v46 = vsel %vm245_vm2, %v250_v44, 4294967295  ;;  %vm263_vm3 = vcmp.eq.s32.totalorder %v91_v41, 33  ;;  %v1153_v39 = vld [vmem:[#allocation8 + $0x18] sm:$0xff]  ;;  %v1282_v44 = vld [vmem:[#allocation9] ss:$0 sm:$0xff] }
  0x65   :  { %1474 = vmatpush3.bf16.msra.mxu0 %v1758_v5  ;;  %1346 = vmatprep.mubr.msk.f32.mxu0 %vm411_vm8, %v1260_v30  ;;  %vm388_vm1 = vcmp.eq.s32.totalorder %v1770_v14, %v236_v42  ;;  %v268_v47 = vstv %s1251_s26  ;;  %vm282_vm5 = vcmp.eq.s32.totalorder %v92_v43, 40  ;;  %v286_v49 = vstv %s1252_s27 }
  0x66   :  { %1471 = vmatpush3.bf16.msra.mxu1 %v1763_v11  ;;  %1475 = vmatprep.subr.bf16.mxu0 %v1656_v4  ;;  %v1261_v45 = vsel %vm388_vm1, 1.0, %v1659_v13  ;;  %v273_v48 = vsel %vm263_vm3, %v268_v47, %v255_v46  ;;  %vm300_vm6 = vcmp.eq.s32.totalorder %v92_v43, 41  ;;  %v292_v50 = vsel %vm282_vm5, %v286_v49, 4294967295 }
  0x67   :  { %1478 = vmatprep.subr.bf16.mxu1 %v1656_v4  ;;  %vm389_vm7 = vcmp.eq.s32.totalorder %v1770_v14, %v273_v48  ;;  %v304_v51 = vstv %s1253_s28  ;;  %v322_v55 = vstv %s1808_s29  ;;  %v94_v56 = vadd.s32 56, %v1760_v10 }
  0x68   :  { %1347 = vmatmul.mubr.msk.f32.gmra.mrb[2].mxu0 %vm411_vm8, %v1261_v45  ;;  %v1262_v53 = vsel %vm389_vm7, 1.0, %v1659_v13  ;;  %v310_v54 = vsel %vm300_vm6, %v304_v51, %v292_v50  ;;  %vm319_vm10 = vcmp.eq.s32.totalorder %v93_v52, 48  ;;  %vm337_vm11 = vcmp.eq.s32.totalorder %v93_v52, 49 }
  0x69   :  { %1477 = vmatpush3.bf16.msra.mxu0 %v1763_v11  ;;  %1349 = vmatprep.mubr.msk.f32.mxu0 %vm411_vm8, %v1262_v53  ;;  %vm390_vm9 = vcmp.eq.s32.totalorder %v1770_v14, %v310_v54  ;;  %v340_v57 = vstv %s1811_s30  ;;  %v329_v59 = vsel %vm319_vm10, %v322_v55, 4294967295  ;;  %vm356_vm12 = vcmp.eq.s32.totalorder %v94_v56, 56 }
  0x6a   :  { %1484 = vmatprep.subr.bf16.mxu0 %v1656_v4  ;;  %v1263_v58 = vsel %vm390_vm9, 1.0, %v1659_v13  ;;  %v358_v60 = vstv %s1813_s7  ;;  %v347_v61 = vsel %vm337_vm11, %v340_v57, %v329_v59  ;;  %vm374_vm13 = vcmp.eq.s32.totalorder %v94_v56, 57 }
  0x6b   :  { %v366_v62 = vsel %vm356_vm12, %v358_v60, 4294967295  ;;  %v376_v63 = vstv %s1816_s1  ;;  %vm391_vm15 = vcmp.eq.s32.totalorder %v1770_v14, %v347_v61 }
  0x6c   :  { %1350 = vmatmul.mubr.msk.f32.gmra.mrb[4].mxu0 %vm411_vm8, %v1263_v58  ;;  %v384_v0 = vsel %vm374_vm13, %v376_v63, %v366_v62  ;;  %v1264_v1 = vsel %vm391_vm15, 1.0, %v1659_v13 }
  0x6d   :  { %vm392_vm0 = vcmp.eq.s32.totalorder %v1770_v14, %v384_v0  ;;  %1352 = vmatprep.mubr.msk.f32.mxu0 %vm411_vm8, %v1264_v1 }
  0x6e   :  { %v1265_v2 = vsel %vm392_vm0, 1.0, %v1659_v13 }
  0x70   :  { %1353 = vmatmul.mubr.msk.f32.gmra.mrb[6].mxu0 %vm411_vm8, %v1265_v2 }
  0x71   :  { %1385 = vmatprep.mubr.msk.f32.mxu0 %vm1658_vm4, %v1659_v13 }
 0x134   :  { %v619_v31 = vpop.f32.mrb[0].mxu1 }
 0x135   :  { %v1365_v32 = vpop.f32.mrb[1].mxu1 }
 0x137   :  { %v1797_v33 = vpop.f32.mrb[0].mxu0 }
 0x138   :  { %v506_v34 = vpop.f32.mrb[1].mxu0 }
 0x139   :  { %v623_v35 = vadd.f32 %v619_v31, %v506_v34 }
 0x13b   :  { %1525 = vtanh.f32 %v623_v35  ;;  %v1348_v9 = vpop.f32.mrb[2].mxu0 }
 0x13c   :  { %v516_v10 = vpop.f32.mrb[3].mxu0 }
 0x13f   :  { %v1351_v12 = vpop.f32.mrb[4].mxu0 }
 0x140   :  { %v526_v14 = vpop.f32.mrb[5].mxu0 }
 0x143   :  { %v1354_v15 = vpop.f32.mrb[6].mxu0 }
 0x144   :  { %v536_v16 = vpop.f32.mrb[7].mxu0 }
 0x145   :  { %v1526_v36 = vpop.eup %1525 }
 0x146   :  { %1375 = vmatmul.mubr.msk.f32.vlgmr.msra.gmra.mrb[2].mxu1 %vm549_vm14, %v1526_v36  ;;  %v1150_v36 = vld [vmem:[#allocation8] sm:$0xff] }
 0x147   :  { %1480 = vmatpush3.bf16.msra.mxu1 %v1758_v5  ;;  %1396 = vmatprep.mubr.msk.f32.mxu1 %vm1658_vm4, %v1659_v13  ;;  %v1509_v38 = vpack.c.bf16 %v1151_v37, %v1150_v36 }
 0x148   :  { %1481 = vmatprep.subr.bf16.mxu1 %v1656_v4 }
 0x14b   :  { %1483 = vmatpush3.bf16.msra.mxu1 %v1763_v11 }
 0x14c   :  { %1490 = vmatprep.subr.bf16.mxu1 %v1656_v4 }
 0x219   :  { %v694_v3 = vpop.f32.mrb[2].mxu1 }
 0x21a   :  { %v698_v6 = vadd.f32 %v1797_v33, %v694_v3  ;;  %v1376_v7 = vpop.f32.mrb[3].mxu1 }
 0x21c   :  { %1527 = vtanh.f32 %v698_v6 }
 0x226   :  { %v1528_v8 = vpop.eup %1527 }
 0x227   :  { %1386 = vmatmul.mubr.msk.f32.vlgmr.msra.gmra.mrb[8].mxu0 %vm549_vm14, %v1528_v8 }
 0x228   :  { %1486 = vmatpush3.bf16.msra.mxu0 %v1758_v5  ;;  %1407 = vmatprep.mubr.msk.f32.mxu0 %vm1658_vm4, %v1659_v13 }
 0x229   :  { %1487 = vmatprep.subr.bf16.mxu0 %v1656_v4 }
 0x22c   :  { %1489 = vmatpush3.bf16.msra.mxu0 %v1763_v11 }
 0x22d   :  { %1496 = vmatprep.subr.bf16.mxu0 %v1656_v4 }
 0x2fa   :  { %v769_v17 = vpop.f32.mrb[8].mxu0 }
 0x2fb   :  { %v773_v18 = vadd.f32 %v769_v17, %v516_v10  ;;  %v1387_v19 = vpop.f32.mrb[9].mxu0 }
 0x2fd   :  { %1529 = vtanh.f32 %v773_v18 }
 0x307   :  { %v1530_v20 = vpop.eup %1529 }
 0x308   :  { %1397 = vmatmul.mubr.msk.f32.vlgmr.msra.gmra.mrb[4].mxu1 %vm549_vm14, %v1530_v20 }
 0x309   :  { %1492 = vmatpush3.bf16.msra.mxu1 %v1758_v5  ;;  %1418 = vmatprep.mubr.msk.f32.mxu1 %vm1658_vm4, %v1659_v13 }
 0x30a   :  { %1493 = vmatprep.subr.bf16.mxu1 %v1656_v4 }
 0x30d   :  { %1495 = vmatpush3.bf16.msra.mxu1 %v1763_v11 }
 0x30e   :  { %1502 = vmatprep.subr.bf16.mxu1 %v1656_v4 }
 0x3db   :  { %v844_v21 = vpop.f32.mrb[4].mxu1 }
 0x3dc   :  { %v848_v22 = vadd.f32 %v1348_v9, %v844_v21  ;;  %v1398_v23 = vpop.f32.mrb[5].mxu1 }
 0x3de   :  { %1531 = vtanh.f32 %v848_v22 }
 0x3e8   :  { %v1532_v24 = vpop.eup %1531 }
 0x3e9   :  { %1408 = vmatmul.mubr.msk.f32.vlgmr.msra.gmra.mrb[10].mxu0 %vm549_vm14, %v1532_v24 }
 0x3ea   :  { %1498 = vmatpush3.bf16.msra.mxu0 %v1758_v5  ;;  %1429 = vmatprep.mubr.msk.f32.mxu0 %vm1658_vm4, %v1659_v13 }
 0x3eb   :  { %1499 = vmatprep.subr.bf16.mxu0 %v1656_v4 }
 0x3ee   :  { %1501 = vmatpush3.bf16.msra.mxu0 %v1763_v11 }
 0x3ef   :  { %1508 = vmatprep.subr.bf16.mxu0 %v1656_v4 }
 0x4bc   :  { %v919_v25 = vpop.f32.mrb[10].mxu0 }
 0x4bd   :  { %v923_v26 = vadd.f32 %v919_v25, %v526_v14  ;;  %v1409_v27 = vpop.f32.mrb[11].mxu0 }
 0x4bf   :  { %1533 = vtanh.f32 %v923_v26 }
 0x4c9   :  { %v1534_v28 = vpop.eup %1533 }
 0x4ca   :  { %1419 = vmatmul.mubr.msk.f32.vlgmr.msra.gmra.mrb[6].mxu1 %vm549_vm14, %v1534_v28 }
 0x4cb   :  { %1504 = vmatpush3.bf16.msra.mxu1 %v1758_v5  ;;  %1440 = vmatprep.mubr.msk.f32.mxu1 %vm1658_vm4, %v1659_v13 }
 0x4cc   :  { %1505 = vmatprep.subr.bf16.mxu1 %v1656_v4 }
 0x4cf   :  { %1507 = vmatpush3.bf16.msra.mxu1 %v1763_v11  ;;  %v1152_v11 = vld [vmem:[#allocation8 + $0x10] sm:$0xff] }
 0x4d0   :  { %v1512_v40 = vpack.c.bf16 %v1153_v39, %v1152_v11 }
 0x59d   :  { %v994_v29 = vpop.f32.mrb[6].mxu1 }
 0x59e   :  { %v998_v30 = vadd.f32 %v1351_v12, %v994_v29  ;;  %v1420_v31 = vpop.f32.mrb[7].mxu1 }
 0x5a0   :  { %1535 = vtanh.f32 %v998_v30 }
 0x5aa   :  { %v1536_v32 = vpop.eup %1535 }
 0x5ab   :  { %1430 = vmatmul.mubr.msk.f32.vlgmr.msra.gmra.mrb[12].mxu0 %vm549_vm14, %v1536_v32 }
 0x5ac   :  { %1451 = vmatprep.mubr.msk.f32.mxu0 %vm1658_vm4, %v1659_v13  ;;  %1510 = vmatpush3.bf16.msra.mxu0 %v1509_v38 }
 0x5ad   :  { %1511 = vmatprep.subr.bf16.mxu0 %v1656_v4 }
 0x5b0   :  { %1513 = vmatpush3.bf16.msra.mxu0 %v1512_v40 }
 0x67e   :  { %v1069_v33 = vpop.f32.mrb[12].mxu0 }
 0x67f   :  { %v1073_v34 = vadd.f32 %v1069_v33, %v536_v16  ;;  %v1431_v5 = vpop.f32.mrb[13].mxu0 }
 0x681   :  { %1537 = vtanh.f32 %v1073_v34 }
 0x68b   :  { %v1538_v35 = vpop.eup %1537 }
 0x68c   :  { %1441 = vmatmul.mubr.msk.f32.vlgmr.msra.gmra.mrb[8].mxu1 %vm549_vm14, %v1538_v35 }
 0x75f   :  { %v1144_v41 = vpop.f32.mrb[8].mxu1 }
 0x760   :  { %v1148_v42 = vadd.f32 %v1354_v15, %v1144_v41  ;;  %v1442_v13 = vpop.f32.mrb[9].mxu1 }
 0x762   :  { %1539 = vtanh.f32 %v1148_v42 }
 0x76c   :  { %v1540_v43 = vpop.eup %1539 }
 0x76d   :  { %1452 = vmatmul.mubr.msk.f32.vlgmr.msra.gmra.mrb[14].mxu0 %vm549_vm14, %v1540_v43 }
 0x840   :  { %v1230_v45 = vpop.f32.mrb[14].mxu0 }
 0x841   :  { %v1231_v46 = vadd.f32 %v1282_v44, %v1230_v45  ;;  %v1453_v47 = vpop.f32.mrb[15].mxu0 }
 0x843   :  { %1234 = vst [vmem:[%s1882_s5] sm:$0xff] %v1231_v46 }
 0x844   :  { %1239 = vsyncpa [#allocation3], 1 }
 0x845   :  { %1240 = vsyncpa [#allocation7], 1 }
 0x846   :  { %1241 = vsyncpa [#allocation10], 1 }
 0x847   :  { %1242 = vsyncpa [#allocation4], 1 }

</bundles_post_ra>
